<compile_context>
chip_gen: v7x
topology: tpu7x:2x2x1
jax: 0.10.0
libtpu: 0.0.40
codegen_flags: <defaults>
</compile_context>

<pallas_src>
import math

import jax
import jax.numpy as jnp
from jax.experimental import pallas as pl
from jax.experimental.pallas import tpu as pltpu

_LANE = 128
_TARGET_TILE_BYTES = 6 * 1024 * 1024      # ~6 MiB output tile per grid step
_MAX_SUPER_ROW_BYTES = 256 * 1024         # cap on the pre-tiled parameter row
_VMEM_LIMIT_CAP = 32 * 1024 * 1024        # safe on v5e/v6e/v7x


def _round_up(x: int, m: int) -> int:
    return ((x + m - 1) // m) * m


def _broadcast_kernel(param_ref, out_ref):
    # param_ref: (1, W) parameter row, resident in VMEM across the whole grid.
    # out_ref:   (TILE_R, W) output tile.  The VPU broadcast is fully hidden
    # under the output write-back DMA.
    out_ref[...] = jnp.broadcast_to(param_ref[...], out_ref.shape)


def _choose_tile_rows(total_rows: int, width: int, itemsize: int, sublane: int) -> int:
    """Pick an output tile height: ~_TARGET_TILE_BYTES, sublane-aligned, and
    small enough that the grid has >= 2 steps when the output is big enough
    (so the "parallel" axis shards across both TensorCores on v7x)."""
    if total_rows <= sublane:
        return total_rows  # single full-extent block (valid even if < sublane)
    target = max(sublane, (_TARGET_TILE_BYTES // (width * itemsize)) // sublane * sublane)
    two_steps = _round_up(pl.cdiv(total_rows, 2), sublane)
    return min(target, two_steps)


def _run_broadcast(param_row: jax.Array, n_rows: int, tile_rows: int) -> jax.Array:
    """Broadcast the (1, W) param_row to (n_rows, W).  n_rows need NOT divide
    tile_rows -- the ragged final block is masked by Pallas."""
    width = param_row.shape[1]
    dtype = param_row.dtype
    itemsize = jnp.dtype(dtype).itemsize
    grid = pl.cdiv(n_rows, tile_rows)

    tile_bytes = tile_rows * width * itemsize
    row_bytes = width * itemsize
    # Double-buffered output tile + (double-buffered) resident param row + slack.
    vmem_limit = int(min(_VMEM_LIMIT_CAP,
                         max(4 * 1024 * 1024, 2 * tile_bytes + 2 * row_bytes + (1 << 20))))

    return pl.pallas_call(
        _broadcast_kernel,
        out_shape=jax.ShapeDtypeStruct((n_rows, width), dtype),
        grid_spec=pltpu.PrefetchScalarGridSpec(
            num_scalar_prefetch=0,
            grid=(grid,),
            # Parameter row: same block every step -> stays resident in VMEM.
            in_specs=[pl.BlockSpec((1, width), lambda i: (0, 0))],
            # Output: one batch tile per grid step (standard write-back pipeline).
            out_specs=pl.BlockSpec((tile_rows, width), lambda i: (i, 0)),
        ),
        compiler_params=pltpu.CompilerParams(
            dimension_semantics=("parallel",),
            vmem_limit_bytes=vmem_limit,
        ),
        cost_estimate=pl.CostEstimate(
            flops=0,
            transcendentals=0,
            bytes_accessed=int(n_rows * width * itemsize + width * itemsize),
        ),
    )(param_row)


def fixed_log_variance_encoder(z: jax.Array, log_var: jax.Array,
                               *, materialize: bool = True) -> jax.Array:
    """Returns log_var broadcast to z.shape[:-1] + (n_input,).

    materialize=False returns a lazy jnp.broadcast_to (free, fuses into any
    elementwise consumer); materialize=True forces the broadcast to land in
    HBM via the Pallas kernel.
    """
    n_input = log_var.shape[0]
    batch_shape = z.shape[:-1]
    out_shape = batch_shape + (n_input,)

    if not materialize:
        # Fastest version of this op is not launching a kernel at all.
        return jnp.broadcast_to(log_var, out_shape)

    b = math.prod(batch_shape) if batch_shape else 1
    dtype = log_var.dtype
    itemsize = jnp.dtype(dtype).itemsize

    if b == 0 or n_input == 0:
        return jnp.broadcast_to(log_var, out_shape)

    # Sublane granularity is dtype dependent (rows pack along sublanes).
    sublane = max(8, 32 // itemsize)          # 8 f32, 16 bf16, 32 int8/fp8

    # Lane-dense super-row: pack `reps` logical rows per lcm(n_input,128)-wide
    # physical row so every store is a full-lane vst.  Only taken when it
    # needs no padding rows / post-kernel slice (b % reps == 0) and the
    # pre-tiled parameter row stays small.
    super_row = n_input * _LANE // math.gcd(n_input, _LANE)   # lcm(n_input, 128)
    reps = super_row // n_input
    lane_dense = (n_input % _LANE == 0) or (
        b % reps == 0 and super_row * itemsize <= _MAX_SUPER_ROW_BYTES
    )

    if lane_dense:
        width = super_row
        total_rows = b // reps
        param_row = (jnp.tile(log_var, reps) if reps > 1 else log_var).reshape(1, width)
    else:
        # Exact (b, n_input) output -- last dim < 128 means masked stores, but
        # that is cheaper than an extra full HBM copy from padding + slicing.
        width = n_input
        total_rows = b
        param_row = log_var.reshape(1, width)

    tile_rows = _choose_tile_rows(total_rows, width, itemsize, sublane)
    out = _run_broadcast(param_row, total_rows, tile_rows)
    # total_rows * width == b * n_input in both paths -> free row-major reshape.
    return out.reshape(out_shape)


if __name__ == "__main__":
    key = jax.random.PRNGKey(0)

    # --- Case 1: lane-dense fast path (128 % n_input == 0, batch divides reps) ---
    n_input = 32
    z = jax.random.normal(key, (2, 8, 8), dtype=jnp.float32)        # b = 16, reps = 4
    log_var = jnp.arange(n_input, dtype=jnp.float32) * 0.01
    var = jax.block_until_ready(fixed_log_variance_encoder(z, log_var))
    ref = jnp.broadcast_to(log_var, z.shape[:-1] + (n_input,))
    assert var.shape == ref.shape, var.shape
    assert var.dtype == jnp.float32
    assert jnp.array_equal(var, ref)

    # --- Case 2: non-divisor n_input, ragged batch (exact-shape, masked tail) ---
    n_input2 = 48
    z2 = jax.random.normal(key, (3, 5, 8), dtype=jnp.float32)       # b = 15
    log_var2 = jnp.arange(n_input2, dtype=jnp.float32) * 0.02
    var2 = jax.block_until_ready(fixed_log_variance_encoder(z2, log_var2))
    ref2 = jnp.broadcast_to(log_var2, z2.shape[:-1] + (n_input2,))
    assert var2.shape == ref2.shape, var2.shape
    assert jnp.array_equal(var2, ref2)

    # --- Case 3: bf16 parameter (16-row sublane granularity), lane-dense ---
    n_input3 = 64
    z3 = jax.random.normal(key, (4, 8, 8), dtype=jnp.bfloat16)      # b = 32, reps = 2
    log_var3 = (jnp.arange(n_input3, dtype=jnp.float32) * 0.03).astype(jnp.bfloat16)
    var3 = jax.block_until_ready(fixed_log_variance_encoder(z3, log_var3))
    ref3 = jnp.broadcast_to(log_var3, z3.shape[:-1] + (n_input3,))
    assert var3.shape == ref3.shape and var3.dtype == jnp.bfloat16
    assert jnp.array_equal(var3, ref3)

    print("KERNEL_OK")
</pallas_src>

<mosaic_0001>
module attributes {stable_mosaic.version = 11 : i64} {
  func.func @_broadcast_kernel(%arg0: i32, %arg1: memref<1x128xf32, #tpu.memory_space<vmem>>, %arg2: memref<4x128xf32, #tpu.memory_space<vmem>>) attributes {dimension_semantics = [#tpu.dimension_semantics<parallel>], iteration_bounds = array<i64: 1>, scalar_prefetch = 0 : i64, scratch_operands = 0 : i64, tpu.core_type = #tpu.core_type<tc>, window_params = [{pipeline_mode = #tpu.pipeline_mode<synchronous>, transform_indices = @transform_0, window_bounds = array<i64: 1, 128>}, {transform_indices = @transform_1, window_bounds = array<i64: 4, 128>}]} {
    %c0 = arith.constant 0 : index
    %c0_0 = arith.constant 0 : index
    %0 = vector.load %arg1[%c0, %c0_0] : memref<1x128xf32, #tpu.memory_space<vmem>>, vector<1x128xf32>
    %1 = vector.shape_cast %0 : vector<1x128xf32> to vector<1x128xf32>
    %2 = vector.broadcast %1 : vector<1x128xf32> to vector<4x128xf32>
    %c0_1 = arith.constant 0 : index
    %c0_2 = arith.constant 0 : index
    %3 = vector.load %arg2[%c0_1, %c0_2] : memref<4x128xf32, #tpu.memory_space<vmem>>, vector<4x128xf32>
    tpu.vector_store %arg2[%c0_1, %c0_2], %2 {strides = array<i32>} : memref<4x128xf32, #tpu.memory_space<vmem>>, vector<4x128xf32>,
    return
  }
  func.func @transform_0(%arg0: i32) -> (i32, i32) {
    %c0_i32 = arith.constant 0 : i32
    %c0_i32_0 = arith.constant 0 : i32
    %c0_i32_1 = arith.constant 0 : i32
    return %c0_i32, %c0_i32_0 : i32, i32
  }
  func.func @transform_1(%arg0: i32) -> (i32, i32) {
    %c0_i32 = arith.constant 0 : i32
    %c0_i32_0 = arith.constant 0 : i32
    return %arg0, %c0_i32 : i32, i32
  }
}

</mosaic_0001>

<bundles_post_ra>
// kernel: tpu_custom_call.1
= control target key start
LH: loop header
LB: loop body
LE: loop exit
PB: predicated region body
PF: predicated region fallthrough
CT: control target
= control target key end

     0   :  { %6 = vsyncpa [#allocation3], 0  ;;  %s131_s0 = inlined_call_operand.hbm [shape: f32[1,128], index: 0, kind: input, shape index: {}]   ;;  %s132_s1 = inlined_call_operand.hbm [shape: f32[4,128], index: 1, kind: output, shape index: {}]  }
   0x1   :  { %7 = vsyncpa [#allocation4], 0  ;;  %s95_s6 = smov [#allocation2]   ;;  %s47_s10 = scalar_lea.hbm %s131_s0, 16 }
   0x2   :  { %s14_s7 = sshll.u32 %s95_s6, 4  ;;  %p48_p0 = scmp.ne.s32.totalorder %s131_s0, %s47_s10  ;;  %s15_s7 = int_to_ptr.vmem [resolvable:$true] %s14_s7 }
   0x3   :  { %p51_p1 = scmp.lt.u32.totalorder %s47_s10, %s131_s0 }
   0x5   :  { %p53_p2 = pnand %p51_p1, %p48_p0 }
   0x7   :  { %56 = shalt.err (!%p53_p2)
}
   0x8   :  { %s57_s15 = scalar_lea.vmem %s15_s7, 16  ;;  %s61_s16 = scalar_lea.vmem %s15_s7, 32 }
   0x9   :  { %p58_p3 = scmp.ne.s32.totalorder %s15_s7, %s57_s15  ;;  %p62_p4 = scmp.lt.s32.totalorder %s15_s7, %s15_s7 }
   0xa   :  { %p63_p5 = scmp.lt.s32.totalorder %s61_s16, %s57_s15 }
   0xc   :  { %p64_p6 = por %p63_p5, %p62_p4 }
   0xe   :  { %p65_p7 = pnand %p64_p6, %p58_p3 }
  0x10   :  { %68 = shalt.err (!%p65_p7)
}
  0x11   :  { %17 = dma.hbm_to_vmem [thread:$0]  %s131_s0, 16, %s15_s7, [#allocation3]  }
  0x12   :  { %91 = dma.done.wait [#allocation3], 16  }
  0x13   :  { %92 = vsyncadd [#allocation3], 4294967280  ;;  %s96_s19 = smov [#allocation5]   ;;  %v44_v0 = vld [vmem:[#allocation2] ss:$0 sm:$0xff] }
  0x14   :  { %s35_s20 = sshll.u32 %s96_s19, 4  ;;  %28 = vst [vmem:[#allocation5] sm:$0xf] %v44_v0  ;;  %s36_s20 = int_to_ptr.vmem [resolvable:$true] %s35_s20 }
  0x15   :  { %s69_s21 = scalar_lea.vmem %s36_s20, 64  ;;  %p74_p9 = scmp.lt.s32.totalorder %s36_s20, %s36_s20 }
  0x16   :  { %p70_p8 = scmp.ne.s32.totalorder %s36_s20, %s69_s21  ;;  %p75_p10 = scmp.lt.s32.totalorder %s69_s21, %s69_s21 }
  0x18   :  { %p76_p11 = por %p75_p10, %p74_p9 }
  0x1a   :  { %p77_p12 = pnand %p76_p11, %p70_p8 }
  0x1c   :  { %80 = shalt.err (!%p77_p12)
}
  0x1d   :  { %s81_s24 = scalar_lea.hbm %s132_s1, 64 }
  0x1e   :  { %p82_p13 = scmp.ne.s32.totalorder %s132_s1, %s81_s24  ;;  %p85_p0 = scmp.lt.u32.totalorder %s81_s24, %s132_s1 }
  0x20   :  { %p87_p1 = pnand %p85_p0, %p82_p13 }
  0x22   :  { %90 = shalt.err (!%p87_p1)
}
  0x23   :  { %38 = dma.vmem_to_hbm [thread:$0]  %s36_s20, 64, %s132_s1, [#allocation4]  }
  0x24   :  { %93 = dma.done.wait [#allocation4], 64  }
  0x25   :  { %94 = vsyncadd [#allocation4], 4294967232 }
  0x26   :  { %42 = vsyncpa [#allocation3], 1 }
  0x27   :  { %43 = vsyncpa [#allocation4], 1 }

</bundles_post_ra>
